<compile_context>
chip_gen: v5e
topology: v5e:2x2
jax: 0.10.0
libtpu: 0.0.40
codegen_flags: <defaults>
</compile_context>

<pallas_src>
import jax
import jax.numpy as jnp
from jax import lax
from jax.experimental import pallas as pl
from jax.experimental.pallas import tpu as pltpu

STATE_DIM = 24
ACTION_DIM = 4
HIDDEN = 96       # encoder hidden size
FF = 192          # encoder feed-forward size
FC2 = 128         # critic hidden size
LN_EPS = 1e-5
MAX_TILE_B = 512  # batch rows per grid step (bounded VMEM, well under v7x's 64 MiB)


def _gelu_exact(x):
    # nn.GELU() default = exact erf formulation.
    return 0.5 * x * (1.0 + lax.erf(x * 0.7071067811865476))


def _layernorm_onepass(x, gamma, beta):
    # One-pass statistics: both lane reductions issued back-to-back,
    # var = E[x^2] - mu^2 (values are O(1) here, numerically fine).
    mu = jnp.mean(x, axis=-1, keepdims=True)
    ex2 = jnp.mean(x * x, axis=-1, keepdims=True)
    var = ex2 - mu * mu
    return (x - mu) * lax.rsqrt(var + LN_EPS) * gamma + beta


def critic_kernel(
    state_ref, action_ref,
    w1_ref, b1_ref, ln1_g_ref, ln1_b_ref,
    w2_ref, b2_ref, w3_ref, b3_ref,
    ln2_g_ref, ln2_b_ref,
    wfc2_s_ref, wfc2_a_ref, bfc2_ref,
    wout_row_ref,
    out_ref,
):
    f32 = jnp.float32
    s = state_ref[...].astype(f32)
    a = action_ref[...].astype(f32)

    # --- FeedForwardEncoder ---
    # x = tanh(LayerNorm(lin1(s)))
    h = jnp.dot(s, w1_ref[...], preferred_element_type=f32) + b1_ref[...]
    h = jnp.tanh(_layernorm_onepass(h, ln1_g_ref[...], ln1_b_ref[...]))

    # xx = lin3(GELU(lin2(x)))
    ff = jnp.dot(h, w2_ref[...], preferred_element_type=f32) + b2_ref[...]
    ff = _gelu_exact(ff)
    ff = jnp.dot(ff, w3_ref[...], preferred_element_type=f32) + b3_ref[...]

    # o = LayerNorm(x + xx)
    enc = _layernorm_onepass(h + ff, ln2_g_ref[...], ln2_b_ref[...])

    # --- Critic head ---
    # concat((enc, action)) @ W_fc2^T  ==  enc @ W_s + action @ W_a
    x = (jnp.dot(enc, wfc2_s_ref[...], preferred_element_type=f32)
         + jnp.dot(a, wfc2_a_ref[...], preferred_element_type=f32)
         + bfc2_ref[...])
    x = _gelu_exact(x)

    # Lane-dense final projection: (1, 128) . (TILE_B, 128)^T -> (1, TILE_B).
    # The *10 scale is already folded into wout_row by the wrapper.
    q = lax.dot_general(wout_row_ref[...], x, (((1,), (1,)), ((), ())),
                        preferred_element_type=f32)
    out_ref[...] = q.astype(out_ref.dtype)


def _round_up(x, m):
    return ((x + m - 1) // m) * m


def critic_forward(state, action, params, max_tile_b=MAX_TILE_B):
    n = state.shape[0]
    tile_b = min(max_tile_b, _round_up(n, 8))
    n_pad = _round_up(n, tile_b)
    num_tiles = n_pad // tile_b
    if n_pad != n:
        state = jnp.pad(state, ((0, n_pad - n), (0, 0)))
        action = jnp.pad(action, ((0, n_pad - n), (0, 0)))

    # Fold *10 into the output weight and lay it out as a lane-dense row [1, 128].
    wout_row = (params["wout"] * 10.0).T

    weights = (
        params["w1"], params["b1"], params["ln1_g"], params["ln1_b"],
        params["w2"], params["b2"], params["w3"], params["b3"],
        params["ln2_g"], params["ln2_b"],
        params["wfc2_s"], params["wfc2_a"], params["bfc2"],
        wout_row,
    )

    def resident_spec(arr):
        # Full-array block, constant index map -> stays in VMEM across all tiles.
        return pl.BlockSpec(arr.shape, lambda i: (0,) * arr.ndim)

    in_specs = (
        [pl.BlockSpec((tile_b, STATE_DIM), lambda i: (i, 0)),
         pl.BlockSpec((tile_b, ACTION_DIM), lambda i: (i, 0))]
        + [resident_spec(w) for w in weights]
    )
    out_spec = pl.BlockSpec((1, tile_b), lambda i: (0, i))

    q_row = pl.pallas_call(
        critic_kernel,
        out_shape=jax.ShapeDtypeStruct((1, n_pad), jnp.float32),
        grid=(num_tiles,),
        in_specs=in_specs,
        out_specs=out_spec,
        compiler_params=pltpu.CompilerParams(
            dimension_semantics=("parallel",),
        ),
    )(state, action, *weights)

    return q_row.reshape(n_pad, 1)[:n]


# ----------------- deterministic parameter construction -----------------

def _xavier_uniform(key, fan_in, fan_out, gain):
    limit = gain * jnp.sqrt(6.0 / (fan_in + fan_out))
    # PyTorch weight shape is [out, in]; sample that, then transpose to [in, out].
    w = jax.random.uniform(key, (fan_out, fan_in), jnp.float32, -limit, limit)
    return w.T


def make_params(key):
    keys = jax.random.split(key, 8)
    gain_tanh = 5.0 / 3.0
    gain_relu = jnp.sqrt(2.0)

    w1 = _xavier_uniform(keys[0], STATE_DIM, HIDDEN, gain_tanh)          # [24, 96]
    b1 = jax.random.uniform(keys[1], (1, HIDDEN), jnp.float32, -0.1, 0.1)
    w2 = _xavier_uniform(keys[2], HIDDEN, FF, gain_relu)                 # [96, 192]
    b2 = jax.random.uniform(keys[3], (1, FF), jnp.float32, -0.1, 0.1)
    w3 = _xavier_uniform(keys[4], FF, HIDDEN, gain_relu)                 # [192, 96]
    b3 = jax.random.uniform(keys[5], (1, HIDDEN), jnp.float32, -0.1, 0.1)

    # fc2: Linear(96 + 4, 128); split weight along input dim into state/action parts.
    wfc2 = _xavier_uniform(keys[6], HIDDEN + ACTION_DIM, FC2, gain_relu)  # [100, 128]
    wfc2_s = wfc2[:HIDDEN, :]                                             # [96, 128]
    wfc2_a = wfc2[HIDDEN:, :]                                             # [4, 128]
    bfc2 = jnp.zeros((1, FC2), jnp.float32)

    # fc_out: Linear(128, 1, bias=False), uniform(-0.003, 0.003)
    wout = jax.random.uniform(keys[7], (1, FC2), jnp.float32, -0.003, 0.003).T  # [128, 1]

    return {
        "w1": w1, "b1": b1,
        "ln1_g": jnp.ones((1, HIDDEN), jnp.float32),
        "ln1_b": jnp.zeros((1, HIDDEN), jnp.float32),
        "w2": w2, "b2": b2, "w3": w3, "b3": b3,
        "ln2_g": jnp.ones((1, HIDDEN), jnp.float32),
        "ln2_b": jnp.zeros((1, HIDDEN), jnp.float32),
        "wfc2_s": wfc2_s, "wfc2_a": wfc2_a, "bfc2": bfc2,
        "wout": wout,
    }


# ----------------- pure-JAX reference for verification -----------------

def _layernorm_ref(x, gamma, beta):
    mu = jnp.mean(x, axis=-1, keepdims=True)
    var = jnp.mean(jnp.square(x - mu), axis=-1, keepdims=True)
    return (x - mu) * lax.rsqrt(var + LN_EPS) * gamma + beta


def critic_reference(state, action, p):
    h = state @ p["w1"] + p["b1"]
    h = jnp.tanh(_layernorm_ref(h, p["ln1_g"], p["ln1_b"]))
    ff = _gelu_exact(h @ p["w2"] + p["b2"]) @ p["w3"] + p["b3"]
    enc = _layernorm_ref(h + ff, p["ln2_g"], p["ln2_b"])
    x = _gelu_exact(enc @ p["wfc2_s"] + action @ p["wfc2_a"] + p["bfc2"])
    return (x @ p["wout"]) * 10.0


if __name__ == "__main__":
    key = jax.random.PRNGKey(0)
    k_state, k_action, k_params = jax.random.split(key, 3)
    params = make_params(k_params)

    # Small sanity batch (single tile).
    n = 8
    state = jax.random.normal(k_state, (n, STATE_DIM), jnp.float32)
    action = jax.random.normal(k_action, (n, ACTION_DIM), jnp.float32)
    q = critic_forward(state, action, params)
    jax.block_until_ready(q)
    q_ref = critic_reference(state, action, params)
    assert q.shape == (n, 1)
    assert jnp.allclose(q, q_ref, atol=1e-4, rtol=1e-4), (q, q_ref)

    # Larger batch exercises the multi-tile grid (pipelining + parallel axis + padding).
    n2 = 1100
    k2s, k2a = jax.random.split(jax.random.PRNGKey(1))
    state2 = jax.random.normal(k2s, (n2, STATE_DIM), jnp.float32)
    action2 = jax.random.normal(k2a, (n2, ACTION_DIM), jnp.float32)
    q2 = critic_forward(state2, action2, params)
    jax.block_until_ready(q2)
    q2_ref = critic_reference(state2, action2, params)
    assert q2.shape == (n2, 1)
    assert jnp.allclose(q2, q2_ref, atol=1e-4, rtol=1e-4)

    print("KERNEL_OK")
</pallas_src>

<mosaic_0001>
module attributes {stable_mosaic.version = 11 : i64} {
  func.func @critic_kernel(%arg0: i32, %arg1: memref<8x24xf32, #tpu.memory_space<vmem>>, %arg2: memref<8x4xf32, #tpu.memory_space<vmem>>, %arg3: memref<24x96xf32, #tpu.memory_space<vmem>>, %arg4: memref<1x96xf32, #tpu.memory_space<vmem>>, %arg5: memref<1x96xf32, #tpu.memory_space<vmem>>, %arg6: memref<1x96xf32, #tpu.memory_space<vmem>>, %arg7: memref<96x192xf32, #tpu.memory_space<vmem>>, %arg8: memref<1x192xf32, #tpu.memory_space<vmem>>, %arg9: memref<192x96xf32, #tpu.memory_space<vmem>>, %arg10: memref<1x96xf32, #tpu.memory_space<vmem>>, %arg11: memref<1x96xf32, #tpu.memory_space<vmem>>, %arg12: memref<1x96xf32, #tpu.memory_space<vmem>>, %arg13: memref<96x128xf32, #tpu.memory_space<vmem>>, %arg14: memref<4x128xf32, #tpu.memory_space<vmem>>, %arg15: memref<1x128xf32, #tpu.memory_space<vmem>>, %arg16: memref<1x128xf32, #tpu.memory_space<vmem>>, %arg17: memref<1x8xf32, #tpu.memory_space<vmem>>) attributes {dimension_semantics = [#tpu.dimension_semantics<parallel>], iteration_bounds = array<i64: 1>, scalar_prefetch = 0 : i64, scratch_operands = 0 : i64, tpu.core_type = #tpu.core_type<tc>, window_params = [{transform_indices = @transform_0, window_bounds = array<i64: 8, 24>}, {transform_indices = @transform_1, window_bounds = array<i64: 8, 4>}, {pipeline_mode = #tpu.pipeline_mode<synchronous>, transform_indices = @transform_2, window_bounds = array<i64: 24, 96>}, {pipeline_mode = #tpu.pipeline_mode<synchronous>, transform_indices = @transform_3, window_bounds = array<i64: 1, 96>}, {pipeline_mode = #tpu.pipeline_mode<synchronous>, transform_indices = @transform_4, window_bounds = array<i64: 1, 96>}, {pipeline_mode = #tpu.pipeline_mode<synchronous>, transform_indices = @transform_5, window_bounds = array<i64: 1, 96>}, {pipeline_mode = #tpu.pipeline_mode<synchronous>, transform_indices = @transform_6, window_bounds = array<i64: 96, 192>}, {pipeline_mode = #tpu.pipeline_mode<synchronous>, transform_indices = @transform_7, window_bounds = array<i64: 1, 192>}, {pipeline_mode = #tpu.pipeline_mode<synchronous>, transform_indices = @transform_8, window_bounds = array<i64: 192, 96>}, {pipeline_mode = #tpu.pipeline_mode<synchronous>, transform_indices = @transform_9, window_bounds = array<i64: 1, 96>}, {pipeline_mode = #tpu.pipeline_mode<synchronous>, transform_indices = @transform_10, window_bounds = array<i64: 1, 96>}, {pipeline_mode = #tpu.pipeline_mode<synchronous>, transform_indices = @transform_11, window_bounds = array<i64: 1, 96>}, {pipeline_mode = #tpu.pipeline_mode<synchronous>, transform_indices = @transform_12, window_bounds = array<i64: 96, 128>}, {pipeline_mode = #tpu.pipeline_mode<synchronous>, transform_indices = @transform_13, window_bounds = array<i64: 4, 128>}, {pipeline_mode = #tpu.pipeline_mode<synchronous>, transform_indices = @transform_14, window_bounds = array<i64: 1, 128>}, {pipeline_mode = #tpu.pipeline_mode<synchronous>, transform_indices = @transform_15, window_bounds = array<i64: 1, 128>}, {transform_indices = @transform_16, window_bounds = array<i64: 1, 8>}]} {
    %c0 = arith.constant 0 : index
    %c0_0 = arith.constant 0 : index
    %0 = vector.load %arg1[%c0, %c0_0] : memref<8x24xf32, #tpu.memory_space<vmem>>, vector<8x24xf32>
    %c0_1 = arith.constant 0 : index
    %c0_2 = arith.constant 0 : index
    %1 = vector.load %arg2[%c0_1, %c0_2] : memref<8x4xf32, #tpu.memory_space<vmem>>, vector<8x4xf32>
    %c0_3 = arith.constant 0 : index
    %c0_4 = arith.constant 0 : index
    %2 = vector.load %arg3[%c0_3, %c0_4] : memref<24x96xf32, #tpu.memory_space<vmem>>, vector<24x96xf32>
    %cst = arith.constant dense<0.000000e+00> : vector<8x96xf32>
    %3 = tpu.matmul %0, %2, %cst {dimension_numbers = #tpu.dot_dimension_numbers<[1], [0], [0], [1], [0, 0, 1, 1], [], []>} : vector<8x24xf32>, vector<24x96xf32>, vector<8x96xf32> -> vector<8x96xf32>
    %c0_5 = arith.constant 0 : index
    %c0_6 = arith.constant 0 : index
    %4 = vector.load %arg4[%c0_5, %c0_6] : memref<1x96xf32, #tpu.memory_space<vmem>>, vector<1x96xf32>
    %5 = vector.broadcast %4 : vector<1x96xf32> to vector<8x96xf32>
    %6 = arith.addf %3, %5 : vector<8x96xf32>
    %c0_7 = arith.constant 0 : index
    %c0_8 = arith.constant 0 : index
    %7 = vector.load %arg5[%c0_7, %c0_8] : memref<1x96xf32, #tpu.memory_space<vmem>>, vector<1x96xf32>
    %c0_9 = arith.constant 0 : index
    %c0_10 = arith.constant 0 : index
    %8 = vector.load %arg6[%c0_9, %c0_10] : memref<1x96xf32, #tpu.memory_space<vmem>>, vector<1x96xf32>
    %cst_11 = arith.constant dense<0.000000e+00> : vector<8xf32>
    %9 = vector.multi_reduction <add>, %6, %cst_11 [1] : vector<8x96xf32> to vector<8xf32>
    %10 = vector.shape_cast %9 : vector<8xf32> to vector<8x1xf32>
    %cst_12 = arith.constant 9.600000e+01 : f32
    %11 = vector.broadcast %cst_12 : f32 to vector<8x1xf32>
    %12 = arith.divf %10, %11 : vector<8x1xf32>
    %13 = arith.mulf %6, %6 : vector<8x96xf32>
    %cst_13 = arith.constant dense<0.000000e+00> : vector<8xf32>
    %14 = vector.multi_reduction <add>, %13, %cst_13 [1] : vector<8x96xf32> to vector<8xf32>
    %15 = vector.shape_cast %14 : vector<8xf32> to vector<8x1xf32>
    %cst_14 = arith.constant 9.600000e+01 : f32
    %16 = vector.broadcast %cst_14 : f32 to vector<8x1xf32>
    %17 = arith.divf %15, %16 : vector<8x1xf32>
    %18 = arith.mulf %12, %12 : vector<8x1xf32>
    %19 = arith.subf %17, %18 : vector<8x1xf32>
    %20 = vector.broadcast %12 : vector<8x1xf32> to vector<8x96xf32>
    %21 = arith.subf %6, %20 : vector<8x96xf32>
    %cst_15 = arith.constant 9.99999974E-6 : f32
    %22 = vector.broadcast %cst_15 : f32 to vector<8x1xf32>
    %23 = arith.addf %19, %22 : vector<8x1xf32>
    %24 = math.rsqrt %23 : vector<8x1xf32>
    %25 = vector.broadcast %24 : vector<8x1xf32> to vector<8x96xf32>
    %26 = arith.mulf %21, %25 : vector<8x96xf32>
    %27 = vector.broadcast %7 : vector<1x96xf32> to vector<8x96xf32>
    %28 = arith.mulf %26, %27 : vector<8x96xf32>
    %29 = vector.broadcast %8 : vector<1x96xf32> to vector<8x96xf32>
    %30 = arith.addf %28, %29 : vector<8x96xf32>
    %31 = math.tanh %30 : vector<8x96xf32>
    %c0_16 = arith.constant 0 : index
    %c0_17 = arith.constant 0 : index
    %32 = vector.load %arg7[%c0_16, %c0_17] : memref<96x192xf32, #tpu.memory_space<vmem>>, vector<96x192xf32>
    %cst_18 = arith.constant dense<0.000000e+00> : vector<8x192xf32>
    %33 = tpu.matmul %31, %32, %cst_18 {dimension_numbers = #tpu.dot_dimension_numbers<[1], [0], [0], [1], [0, 0, 1, 1], [], []>} : vector<8x96xf32>, vector<96x192xf32>, vector<8x192xf32> -> vector<8x192xf32>
    %c0_19 = arith.constant 0 : index
    %c0_20 = arith.constant 0 : index
    %34 = vector.load %arg8[%c0_19, %c0_20] : memref<1x192xf32, #tpu.memory_space<vmem>>, vector<1x192xf32>
    %35 = vector.broadcast %34 : vector<1x192xf32> to vector<8x192xf32>
    %36 = arith.addf %33, %35 : vector<8x192xf32>
    %cst_21 = arith.constant 5.000000e-01 : f32
    %37 = vector.broadcast %cst_21 : f32 to vector<8x192xf32>
    %38 = arith.mulf %37, %36 : vector<8x192xf32>
    %cst_22 = arith.constant 0.707106769 : f32
    %39 = vector.broadcast %cst_22 : f32 to vector<8x192xf32>
    %40 = arith.mulf %36, %39 : vector<8x192xf32>
    %41 = math.erf %40 : vector<8x192xf32>
    %cst_23 = arith.constant 1.000000e+00 : f32
    %42 = vector.broadcast %cst_23 : f32 to vector<8x192xf32>
    %43 = arith.addf %42, %41 : vector<8x192xf32>
    %44 = arith.mulf %38, %43 : vector<8x192xf32>
    %c0_24 = arith.constant 0 : index
    %c0_25 = arith.constant 0 : index
    %45 = vector.load %arg9[%c0_24, %c0_25] : memref<192x96xf32, #tpu.memory_space<vmem>>, vector<192x96xf32>
    %cst_26 = arith.constant dense<0.000000e+00> : vector<8x96xf32>
    %46 = tpu.matmul %44, %45, %cst_26 {dimension_numbers = #tpu.dot_dimension_numbers<[1], [0], [0], [1], [0, 0, 1, 1], [], []>} : vector<8x192xf32>, vector<192x96xf32>, vector<8x96xf32> -> vector<8x96xf32>
    %c0_27 = arith.constant 0 : index
    %c0_28 = arith.constant 0 : index
    %47 = vector.load %arg10[%c0_27, %c0_28] : memref<1x96xf32, #tpu.memory_space<vmem>>, vector<1x96xf32>
    %48 = vector.broadcast %47 : vector<1x96xf32> to vector<8x96xf32>
    %49 = arith.addf %46, %48 : vector<8x96xf32>
    %50 = arith.addf %31, %49 : vector<8x96xf32>
    %c0_29 = arith.constant 0 : index
    %c0_30 = arith.constant 0 : index
    %51 = vector.load %arg11[%c0_29, %c0_30] : memref<1x96xf32, #tpu.memory_space<vmem>>, vector<1x96xf32>
    %c0_31 = arith.constant 0 : index
    %c0_32 = arith.constant 0 : index
    %52 = vector.load %arg12[%c0_31, %c0_32] : memref<1x96xf32, #tpu.memory_space<vmem>>, vector<1x96xf32>
    %cst_33 = arith.constant dense<0.000000e+00> : vector<8xf32>
    %53 = vector.multi_reduction <add>, %50, %cst_33 [1] : vector<8x96xf32> to vector<8xf32>
    %54 = vector.shape_cast %53 : vector<8xf32> to vector<8x1xf32>
    %cst_34 = arith.constant 9.600000e+01 : f32
    %55 = vector.broadcast %cst_34 : f32 to vector<8x1xf32>
    %56 = arith.divf %54, %55 : vector<8x1xf32>
    %57 = arith.mulf %50, %50 : vector<8x96xf32>
    %cst_35 = arith.constant dense<0.000000e+00> : vector<8xf32>
    %58 = vector.multi_reduction <add>, %57, %cst_35 [1] : vector<8x96xf32> to vector<8xf32>
    %59 = vector.shape_cast %58 : vector<8xf32> to vector<8x1xf32>
    %cst_36 = arith.constant 9.600000e+01 : f32
    %60 = vector.broadcast %cst_36 : f32 to vector<8x1xf32>
    %61 = arith.divf %59, %60 : vector<8x1xf32>
    %62 = arith.mulf %56, %56 : vector<8x1xf32>
    %63 = arith.subf %61, %62 : vector<8x1xf32>
    %64 = vector.broadcast %56 : vector<8x1xf32> to vector<8x96xf32>
    %65 = arith.subf %50, %64 : vector<8x96xf32>
    %cst_37 = arith.constant 9.99999974E-6 : f32
    %66 = vector.broadcast %cst_37 : f32 to vector<8x1xf32>
    %67 = arith.addf %63, %66 : vector<8x1xf32>
    %68 = math.rsqrt %67 : vector<8x1xf32>
    %69 = vector.broadcast %68 : vector<8x1xf32> to vector<8x96xf32>
    %70 = arith.mulf %65, %69 : vector<8x96xf32>
    %71 = vector.broadcast %51 : vector<1x96xf32> to vector<8x96xf32>
    %72 = arith.mulf %70, %71 : vector<8x96xf32>
    %73 = vector.broadcast %52 : vector<1x96xf32> to vector<8x96xf32>
    %74 = arith.addf %72, %73 : vector<8x96xf32>
    %c0_38 = arith.constant 0 : index
    %c0_39 = arith.constant 0 : index
    %75 = vector.load %arg13[%c0_38, %c0_39] : memref<96x128xf32, #tpu.memory_space<vmem>>, vector<96x128xf32>
    %cst_40 = arith.constant dense<0.000000e+00> : vector<8x128xf32>
    %76 = tpu.matmul %74, %75, %cst_40 {dimension_numbers = #tpu.dot_dimension_numbers<[1], [0], [0], [1], [0, 0, 1, 1], [], []>} : vector<8x96xf32>, vector<96x128xf32>, vector<8x128xf32> -> vector<8x128xf32>
    %c0_41 = arith.constant 0 : index
    %c0_42 = arith.constant 0 : index
    %77 = vector.load %arg14[%c0_41, %c0_42] : memref<4x128xf32, #tpu.memory_space<vmem>>, vector<4x128xf32>
    %cst_43 = arith.constant dense<0.000000e+00> : vector<8x128xf32>
    %78 = tpu.matmul %1, %77, %cst_43 {dimension_numbers = #tpu.dot_dimension_numbers<[1], [0], [0], [1], [0, 0, 1, 1], [], []>} : vector<8x4xf32>, vector<4x128xf32>, vector<8x128xf32> -> vector<8x128xf32>
    %79 = arith.addf %76, %78 : vector<8x128xf32>
    %c0_44 = arith.constant 0 : index
    %c0_45 = arith.constant 0 : index
    %80 = vector.load %arg15[%c0_44, %c0_45] : memref<1x128xf32, #tpu.memory_space<vmem>>, vector<1x128xf32>
    %81 = vector.broadcast %80 : vector<1x128xf32> to vector<8x128xf32>
    %82 = arith.addf %79, %81 : vector<8x128xf32>
    %cst_46 = arith.constant 5.000000e-01 : f32
    %83 = vector.broadcast %cst_46 : f32 to vector<8x128xf32>
    %84 = arith.mulf %83, %82 : vector<8x128xf32>
    %cst_47 = arith.constant 0.707106769 : f32
    %85 = vector.broadcast %cst_47 : f32 to vector<8x128xf32>
    %86 = arith.mulf %82, %85 : vector<8x128xf32>
    %87 = math.erf %86 : vector<8x128xf32>
    %cst_48 = arith.constant 1.000000e+00 : f32
    %88 = vector.broadcast %cst_48 : f32 to vector<8x128xf32>
    %89 = arith.addf %88, %87 : vector<8x128xf32>
    %90 = arith.mulf %84, %89 : vector<8x128xf32>
    %c0_49 = arith.constant 0 : index
    %c0_50 = arith.constant 0 : index
    %91 = vector.load %arg16[%c0_49, %c0_50] : memref<1x128xf32, #tpu.memory_space<vmem>>, vector<1x128xf32>
    %cst_51 = arith.constant dense<0.000000e+00> : vector<1x8xf32>
    %92 = tpu.matmul %91, %90, %cst_51 {dimension_numbers = #tpu.dot_dimension_numbers<[1], [1], [0], [0], [0, 0, 1, 0], [], []>} : vector<1x128xf32>, vector<8x128xf32>, vector<1x8xf32> -> vector<1x8xf32>
    %c0_52 = arith.constant 0 : index
    %c0_53 = arith.constant 0 : index
    %93 = vector.load %arg17[%c0_52, %c0_53] : memref<1x8xf32, #tpu.memory_space<vmem>>, vector<1x8xf32>
    tpu.vector_store %arg17[%c0_52, %c0_53], %92 {strides = array<i32>} : memref<1x8xf32, #tpu.memory_space<vmem>>, vector<1x8xf32>,
    return
  }
  func.func @transform_0(%arg0: i32) -> (i32, i32) {
    %c0_i32 = arith.constant 0 : i32
    %c0_i32_0 = arith.constant 0 : i32
    return %arg0, %c0_i32 : i32, i32
  }
  func.func @transform_1(%arg0: i32) -> (i32, i32) {
    %c0_i32 = arith.constant 0 : i32
    %c0_i32_0 = arith.constant 0 : i32
    return %arg0, %c0_i32 : i32, i32
  }
  func.func @transform_2(%arg0: i32) -> (i32, i32) {
    %c0_i32 = arith.constant 0 : i32
    %c0_i32_0 = arith.constant 0 : i32
    %c0_i32_1 = arith.constant 0 : i32
    return %c0_i32, %c0_i32_0 : i32, i32
  }
  func.func @transform_3(%arg0: i32) -> (i32, i32) {
    %c0_i32 = arith.constant 0 : i32
    %c0_i32_0 = arith.constant 0 : i32
    %c0_i32_1 = arith.constant 0 : i32
    return %c0_i32, %c0_i32_0 : i32, i32
  }
  func.func @transform_4(%arg0: i32) -> (i32, i32) {
    %c0_i32 = arith.constant 0 : i32
    %c0_i32_0 = arith.constant 0 : i32
    %c0_i32_1 = arith.constant 0 : i32
    return %c0_i32, %c0_i32_0 : i32, i32
  }
  func.func @transform_5(%arg0: i32) -> (i32, i32) {
    %c0_i32 = arith.constant 0 : i32
    %c0_i32_0 = arith.constant 0 : i32
    %c0_i32_1 = arith.constant 0 : i32
    return %c0_i32, %c0_i32_0 : i32, i32
  }
  func.func @transform_6(%arg0: i32) -> (i32, i32) {
    %c0_i32 = arith.constant 0 : i32
    %c0_i32_0 = arith.constant 0 : i32
    %c0_i32_1 = arith.constant 0 : i32
    return %c0_i32, %c0_i32_0 : i32, i32
  }
  func.func @transform_7(%arg0: i32) -> (i32, i32) {
    %c0_i32 = arith.constant 0 : i32
    %c0_i32_0 = arith.constant 0 : i32
    %c0_i32_1 = arith.constant 0 : i32
    return %c0_i32, %c0_i32_0 : i32, i32
  }
  func.func @transform_8(%arg0: i32) -> (i32, i32) {
    %c0_i32 = arith.constant 0 : i32
    %c0_i32_0 = arith.constant 0 : i32
    %c0_i32_1 = arith.constant 0 : i32
    return %c0_i32, %c0_i32_0 : i32, i32
  }
  func.func @transform_9(%arg0: i32) -> (i32, i32) {
    %c0_i32 = arith.constant 0 : i32
    %c0_i32_0 = arith.constant 0 : i32
    %c0_i32_1 = arith.constant 0 : i32
    return %c0_i32, %c0_i32_0 : i32, i32
  }
  func.func @transform_10(%arg0: i32) -> (i32, i32) {
    %c0_i32 = arith.constant 0 : i32
    %c0_i32_0 = arith.constant 0 : i32
    %c0_i32_1 = arith.constant 0 : i32
    return %c0_i32, %c0_i32_0 : i32, i32
  }
  func.func @transform_11(%arg0: i32) -> (i32, i32) {
    %c0_i32 = arith.constant 0 : i32
    %c0_i32_0 = arith.constant 0 : i32
    %c0_i32_1 = arith.constant 0 : i32
    return %c0_i32, %c0_i32_0 : i32, i32
  }
  func.func @transform_12(%arg0: i32) -> (i32, i32) {
    %c0_i32 = arith.constant 0 : i32
    %c0_i32_0 = arith.constant 0 : i32
    %c0_i32_1 = arith.constant 0 : i32
    return %c0_i32, %c0_i32_0 : i32, i32
  }
  func.func @transform_13(%arg0: i32) -> (i32, i32) {
    %c0_i32 = arith.constant 0 : i32
    %c0_i32_0 = arith.constant 0 : i32
    %c0_i32_1 = arith.constant 0 : i32
    return %c0_i32, %c0_i32_0 : i32, i32
  }
  func.func @transform_14(%arg0: i32) -> (i32, i32) {
    %c0_i32 = arith.constant 0 : i32
    %c0_i32_0 = arith.constant 0 : i32
    %c0_i32_1 = arith.constant 0 : i32
    return %c0_i32, %c0_i32_0 : i32, i32
  }
  func.func @transform_15(%arg0: i32) -> (i32, i32) {
    %c0_i32 = arith.constant 0 : i32
    %c0_i32_0 = arith.constant 0 : i32
    %c0_i32_1 = arith.constant 0 : i32
    return %c0_i32, %c0_i32_0 : i32, i32
  }
  func.func @transform_16(%arg0: i32) -> (i32, i32) {
    %c0_i32 = arith.constant 0 : i32
    %c0_i32_0 = arith.constant 0 : i32
    return %c0_i32, %arg0 : i32, i32
  }
}

</mosaic_0001>

<bundles_post_ra>
// kernel: tpu_custom_call.1
= control target key start
LH: loop header
LB: loop body
LE: loop exit
PB: predicated region body
PF: predicated region fallthrough
CT: control target
= control target key end

     0   :  { %s1036_s0 = inlined_call_operand.vmem [shape: f32[8,24], index: 0, kind: input, shape index: {}]   ;;  %s1037_s1 = inlined_call_operand.vmem [shape: f32[8,4], index: 1, kind: input, shape index: {}]   ;;  %s1038_s2 = inlined_call_operand.hbm [shape: f32[24,96], index: 2, kind: input, shape index: {}]   ;;  %s1039_s3 = inlined_call_operand.hbm [shape: f32[1,96], index: 3, kind: input, shape index: {}]   ;;  %s1040_s4 = inlined_call_operand.vmem [shape: f32[1,96], index: 4, kind: input, shape index: {}]   ;;  %s1041_s5 = inlined_call_operand.vmem [shape: f32[1,96], index: 5, kind: input, shape index: {}]   ;;  %s1042_s6 = inlined_call_operand.hbm [shape: f32[96,192], index: 6, kind: input, shape index: {}]   ;;  %s1043_s7 = inlined_call_operand.vmem [shape: f32[1,192], index: 7, kind: input, shape index: {}]   ;;  %s1044_s8 = inlined_call_operand.hbm [shape: f32[192,96], index: 8, kind: input, shape index: {}]   ;;  %s1045_s9 = inlined_call_operand.vmem [shape: f32[1,96], index: 9, kind: input, shape index: {}]   ;;  %s1046_s10 = inlined_call_operand.vmem [shape: f32[1,96], index: 10, kind: input, shape index: {}]   ;;  %s1047_s11 = inlined_call_operand.vmem [shape: f32[1,96], index: 11, kind: input, shape index: {}]   ;;  %s1048_s12 = inlined_call_operand.hbm [shape: f32[96,128], index: 12, kind: input, shape index: {}]   ;;  %s1049_s13 = inlined_call_operand.vmem [shape: f32[4,128], index: 13, kind: input, shape index: {}]   ;;  %s1050_s14 = inlined_call_operand.vmem [shape: f32[1,128], index: 14, kind: input, shape index: {}]   ;;  %s1051_s15 = inlined_call_operand.vmem [shape: f32[1,128], index: 15, kind: input, shape index: {}]   ;;  %s1052_s16 = inlined_call_operand.hbm [shape: f32[1,8], index: 16, kind: output, shape index: {}]  }
   0x1   :  { %1053 = sst [smem:[#allocation16_spill]] %s1036_s0 }
   0x2   :  { %21 = vsyncpa [#allocation3], 0 }
   0x3   :  { %22 = vsyncpa [#allocation6], 0 }
   0x4   :  { %23 = vsyncpa [#allocation9], 0  ;;  %s47_s23 = sshll.u32 %s1039_s3, 4  ;;  %s48_s23 = int_to_ptr.hbm [resolvable:$true] %s47_s23 }
   0x5   :  { %24 = vsyncpa [#allocation4], 0  ;;  %s823_s24 = smov [#allocation5]   ;;  %s76_s28 = sshll.u32 %s1044_s8, 4  ;;  %s77_s28 = int_to_ptr.hbm [resolvable:$true] %s76_s28 }
   0x6   :  { %s49_s25 = sshll.u32 %s823_s24, 4  ;;  %s824_s29 = smov [#allocation8]   ;;  %s50_s25 = int_to_ptr.vmem [resolvable:$true] %s49_s25 }
   0x7   :  { %52 = dma.hbm_to_vmem [thread:$0]  %s48_s23, 16, %s50_s25, [#allocation6]  }
   0x8   :  { %s78_s30 = sshll.u32 %s824_s29, 4  ;;  %s33_s18 = sshll.u32 %s1038_s2, 4  ;;  %s79_s30 = int_to_ptr.vmem [resolvable:$true] %s78_s30  ;;  %s34_s18 = int_to_ptr.hbm [resolvable:$true] %s33_s18 }
   0x9   :  { %s825_s3 = smov 128   ;;  %s826_s19 = smov 8  }
   0xa   :  { %84 = dma.hbm_to_vmem [thread:$0]  %s77_s28, 3072, %s79_s30, [#allocation9], %s825_s3, %s825_s3, %s826_s19  }
   0xb   :  { %s61_s22 = sshll.u32 %s1042_s6, 4  ;;  %s827_s23 = smov [#allocation2]   ;;  %s62_s22 = int_to_ptr.hbm [resolvable:$true] %s61_s22 }
   0xc   :  { %s35_s24 = sshll.u32 %s827_s23, 4  ;;  %s828_s8 = smov [#allocation7]   ;;  %s36_s24 = int_to_ptr.vmem [resolvable:$true] %s35_s24 }
   0xd   :  { %41 = dma.hbm_to_vmem [thread:$0]  %s34_s18, 384, %s36_s24, [#allocation3], %s825_s3, %s825_s3, %s826_s19  }
   0xe   :  { %s63_s25 = sshll.u32 %s828_s8, 4  ;;  %s829_s26 = smov 256   ;;  %s64_s25 = int_to_ptr.vmem [resolvable:$true] %s63_s25 }
   0xf   :  { %s830_s27 = smov 16   ;;  %s95_s0 = sshll.u32 %s1048_s12, 4  ;;  %s96_s0 = int_to_ptr.hbm [resolvable:$true] %s95_s0 }
  0x10   :  { %69 = dma.hbm_to_vmem [thread:$0]  %s62_s22, 3072, %s64_s25, [#allocation6], %s829_s26, %s829_s26, %s830_s27  }
  0x11   :  { %s831_s28 = smov [#allocation10]  }
  0x12   :  { %s97_s30 = sshll.u32 %s831_s28, 4  ;;  %s98_s30 = int_to_ptr.vmem [resolvable:$true] %s97_s30 }
  0x13   :  { %103 = dma.hbm_to_vmem [thread:$0]  %s96_s0, 1536, %s98_s30, [#allocation9], %s825_s3, %s825_s3, %s826_s19  }
  0x14   :  { %815 = dma.done.wait [#allocation3], 384  }
  0x15   :  { %816 = vsyncadd [#allocation3], 4294966912 }
  0x16   :  { %817 = dma.done.wait [#allocation6], 3088  }
  0x17   :  { %818 = vsyncadd [#allocation6], 4294964208 }
  0x18   :  { %819 = dma.done.wait [#allocation9], 4608  }
  0x19   :  { %820 = vsyncadd [#allocation9], 4294962688  ;;  %v134_v0 = vld [vmem:[#allocation2 + $0x10] sm:$0xff]  ;;  %v133_v1 = vld [vmem:[#allocation2 + $0x8] sm:$0xff]  ;;  %s1054_s18 = sld [smem:[#allocation16_spill]]  ;;  %vm139_vm0 = vcmask 195584  }
  0x1a   :  { %156 = vmatpush.msra.mxu0 %v134_v0  ;;  %v132_v2 = vld [vmem:[#allocation2] sm:$0xff]  ;;  %v650_v4 = vld [vmem:[#allocation5] ss:$0 sm:$0xff]  ;;  %vm165_vm1 = vcmask 785408   ;;  %v832_v10 = vmov 96.0   ;;  %v228_v14 = vld [vmem:[#allocation7 + $0xb0] sm:$0xff] }
  0x1b   :  { %657 = vrcp.f32 %v832_v10  ;;  %v229_v15 = vld [vmem:[#allocation7 + $0xb8] sm:$0xff]  ;;  %243 = vmatpush.msra.mxu1 %v228_v14  ;;  %v226_v16 = vld [vmem:[#allocation7 + $0xa0] sm:$0xff]  ;;  %v227_v17 = vld [vmem:[#allocation7 + $0xa8] sm:$0xff]  ;;  %vm395_vm14 = vcmask 523264   ;;  %vm491_vm15 = vcmask 1043456   ;;  %s617_s28 = sshll.u32 %s1052_s16, 4  ;;  %s618_s28 = int_to_ptr.hbm [resolvable:$true] %s617_s28 }
  0x1c   :  { %157 = vmatpush.msra.mxu0 %v133_v1  ;;  %263 = vmatpush.msra.mxu2 %v229_v15  ;;  %v224_v19 = vld [vmem:[#allocation7 + $0x90] sm:$0xff]  ;;  %v225_v20 = vld [vmem:[#allocation7 + $0x98] sm:$0xff]  ;;  %v222_v21 = vld [vmem:[#allocation7 + $0x80] sm:$0xff] }
  0x1d   :  { %244 = vmatpush.msra.mxu1 %v226_v16  ;;  %v223_v22 = vld [vmem:[#allocation7 + $0x88] sm:$0xff]  ;;  %v220_v24 = vld [vmem:[#allocation7 + $0x70] sm:$0xff]  ;;  %v221_v25 = vld [vmem:[#allocation7 + $0x78] sm:$0xff] }
  0x1e   :  { %158 = vmatpush.msra.mxu0 %v132_v2  ;;  %264 = vmatpush.msra.mxu2 %v227_v17  ;;  %v218_v27 = vld [vmem:[#allocation7 + $0x60] sm:$0xff]  ;;  %v219_v28 = vld [vmem:[#allocation7 + $0x68] sm:$0xff]  ;;  %v216_v30 = vld [vmem:[#allocation7 + $0x50] sm:$0xff] }
  0x1f   :  { %v130_v3 = vld [vmem:[%s1054_s18] sm:$0xff]  ;;  %245 = vmatpush.msra.mxu1 %v224_v19  ;;  %v217_v31 = vld [vmem:[#allocation7 + $0x58] sm:$0xff]  ;;  %v212_v34 = vld [vmem:[#allocation7 + $0x30] sm:$0xff] }
  0x20   :  { %629 = vmatmul.msk.f32.vlgmr.msra.gmra.mxu0 %vm139_vm0, %v130_v3  ;;  %265 = vmatpush.msra.mxu2 %v225_v20  ;;  %v214_v32 = vld [vmem:[#allocation7 + $0x40] sm:$0xff]  ;;  %v215_v33 = vld [vmem:[#allocation7 + $0x48] sm:$0xff]  ;;  %v213_v35 = vld [vmem:[#allocation7 + $0x38] sm:$0xff]  ;;  %vm487_vm0 = vcmask 31744  }
  0x21   :  { %v658_v11 = vpop.eup %657  ;;  %246 = vmatpush.msra.mxu1 %v222_v21  ;;  %v210_v37 = vld [vmem:[#allocation7 + $0x20] sm:$0xff]  ;;  %v211_v38 = vld [vmem:[#allocation7 + $0x28] sm:$0xff]  ;;  %v208_v40 = vld [vmem:[#allocation7 + $0x10] sm:$0xff] }
  0x22   :  { %v170_v12 = vmul.f32 96.0, %v658_v11  ;;  %266 = vmatpush.msra.mxu2 %v223_v22  ;;  %vm174_vm2 = vweird.f32 %v658_v11  ;;  %v209_v41 = vld [vmem:[#allocation7 + $0x18] sm:$0xff]  ;;  %v206_v44 = vld [vmem:[#allocation7] sm:$0xff]  ;;  %v207_v45 = vld [vmem:[#allocation7 + $0x8] sm:$0xff] }
  0x23   :  { %247 = vmatpush.msra.mxu1 %v220_v24  ;;  %v651_v55 = vld [vmem:[%s1040_s4] ss:$0 sm:$0xff]  ;;  %v382_v62 = vld [vmem:[#allocation8 + $0x78] sm:$0xff]  ;;  %v381_v63 = vld [vmem:[#allocation8 + $0x70] sm:$0xff] }
  0x24   :  { %v171_v13 = vsub.f32 1.0, %v170_v12  ;;  %267 = vmatpush.msra.mxu2 %v221_v25  ;;  %v652_v58 = vld [vmem:[%s1041_s5] ss:$0 sm:$0xff]  ;;  %399 = vmatpush.msra.mxu3 %v382_v62  ;;  %v380_v1 = vld [vmem:[#allocation8 + $0x68] sm:$0xff]  ;;  %v374_v16 = vld [vmem:[#allocation8 + $0x38] sm:$0xff] }
  0x25   :  { %248 = vmatpush.msra.mxu1 %v218_v27  ;;  %v230_v0 = vld [vmem:[%s1043_s7] sm:$0x3]  ;;  %v376_v10 = vld [vmem:[#allocation8 + $0x48] sm:$0xff]  ;;  %v373_v19 = vld [vmem:[#allocation8 + $0x30] sm:$0xff] }
  0x26   :  { %v172_v18 = vmul.f32 %v658_v11, %v171_v13  ;;  %268 = vmatpush.msra.mxu2 %v219_v28  ;;  %400 = vmatpush.msra.mxu3 %v381_v63  ;;  %v232_v2 = vperm.slane %v230_v0, 0  ;;  %v379_v3 = vld [vmem:[#allocation8 + $0x60] sm:$0xff]  ;;  %v390_v28 = vld [vmem:[#allocation8 + $0xb8] sm:$0xff] }
  0x27   :  { %249 = vmatpush.msra.mxu1 %v216_v30  ;;  %v375_v12 = vld [vmem:[#allocation8 + $0x40] sm:$0xff]  ;;  %427 = vmatpush.msrb.mxu0 %v390_v28 }
  0x28   :  { %v173_v23 = vadd.f32 %v658_v11, %v172_v18  ;;  %269 = vmatpush.msra.mxu2 %v217_v31  ;;  %401 = vmatpush.msra.mxu3 %v380_v1  ;;  %v371_v27 = vld [vmem:[#allocation8 + $0x20] sm:$0xff] }
  0x29   :  { %250 = vmatpush.msra.mxu1 %v214_v32  ;;  %v383_v62 = vld [vmem:[#allocation8 + $0x80] sm:$0xff] }
  0x2a   :  { %v944_v29 = vsel %vm174_vm2, %v658_v11, %v173_v23  ;;  %270 = vmatpush.msra.mxu2 %v215_v33  ;;  %402 = vmatpush.msra.mxu3 %v379_v3  ;;  %v372_v23 = vld [vmem:[#allocation8 + $0x28] sm:$0xff] }
  0x2b   :  { %251 = vmatpush.msra.mxu1 %v212_v34  ;;  %v370_v34 = vld [vmem:[#allocation8 + $0x18] sm:$0xff] }
  0x2c   :  { %271 = vmatpush.msra.mxu2 %v213_v35  ;;  %v389_v35 = vld [vmem:[#allocation8 + $0xb0] sm:$0xff] }
  0x2d   :  { %252 = vmatpush.msra.mxu1 %v210_v37  ;;  %428 = vmatpush.msrb.mxu0 %v389_v35 }
  0x2e   :  { %272 = vmatpush.msra.mxu2 %v211_v38 }
  0x2f   :  { %253 = vmatpush.msra.mxu1 %v208_v40  ;;  %v388_v40 = vld [vmem:[#allocation8 + $0xa8] sm:$0xff] }
  0x30   :  { %273 = vmatpush.msra.mxu2 %v209_v41  ;;  %429 = vmatpush.msrb.mxu0 %v388_v40 }
  0x31   :  { %254 = vmatpush.msra.mxu1 %v206_v44  ;;  %v368_v44 = vld [vmem:[#allocation8 + $0x8] sm:$0xff] }
  0x32   :  { %274 = vmatpush.msra.mxu2 %v207_v45  ;;  %v387_v45 = vld [vmem:[#allocation8 + $0xa0] sm:$0xff] }
  0x33   :  { %430 = vmatpush.msrb.mxu0 %v387_v45 }
  0x9d   :  { %v160_v5 = vpop.f32.mrf.mxu0 }
  0x9e   :  { %v937_v6 = vadd.f32 %v650_v4, %v160_v5  ;;  %v378_v4 = vld [vmem:[#allocation8 + $0x58] sm:$0xff] }
  0x9f   :  { %403 = vmatpush.msra.mxu3 %v378_v4 }
  0xa0   :  { %v166_v7 = vsel %vm165_vm1, %v937_v6, 0.0  ;;  %v177_v8 = vmul.f32 %v937_v6, %v937_v6 }
  0xa1   :  { %167 = vadd.xlane.f32.xlu0 %v166_v7  ;;  %v377_v7 = vld [vmem:[#allocation8 + $0x50] sm:$0xff] }
  0xa2   :  { %v178_v9 = vsel %vm165_vm1, %v177_v8, 0.0  ;;  %404 = vmatpush.msra.mxu3 %v377_v7 }
  0xa4   :  { %405 = vmatpush.msra.mxu3 %v376_v10 }
  0xa6   :  { %406 = vmatpush.msra.mxu3 %v375_v12 }
  0xa8   :  { %407 = vmatpush.msra.mxu3 %v374_v16 }
  0xa9   :  { %179 = vadd.xlane.f32.xlu0 %v178_v9  ;;  %v233_v9 = vperm.slane %v230_v0, 1 }
  0xaa   :  { %408 = vmatpush.msra.mxu3 %v373_v19 }
  0xac   :  { %409 = vmatpush.msra.mxu3 %v372_v23 }
  0xae   :  { %410 = vmatpush.msra.mxu3 %v371_v27 }
  0xb0   :  { %411 = vmatpush.msra.mxu3 %v370_v34 }
 0x114   :  { %v168_v26 = vpop.xlane.xlu0 %167 }
 0x115   :  { %v176_v36 = vmul.f32 %v944_v29, %v168_v26 }
 0x117   :  { %v182_v42 = vmul.f32 %v176_v36, %v176_v36  ;;  %v184_v54 = vsub.f32 %v937_v6, %v176_v36 }
 0x11c   :  { %v180_v39 = vpop.xlane.xlu0 %179 }
 0x11d   :  { %v181_v43 = vmul.f32 %v180_v39, %v944_v29  ;;  %v369_v39 = vld [vmem:[#allocation8 + $0x10] sm:$0xff] }
 0x11e   :  { %412 = vmatpush.msra.mxu3 %v369_v39 }
 0x11f   :  { %v183_v46 = vsub.f32 %v181_v43, %v182_v42 }
 0x120   :  { %413 = vmatpush.msra.mxu3 %v368_v44 }
 0x121   :  { %v185_v47 = vadd.f32 1e-05, %v183_v46 }
 0x123   :  { %659 = vrsqrt.f32 %v185_v47  ;;  %vm192_vm4 = vweird.f32 %v185_v47 }
 0x129   :  { %v660_v48 = vpop.eup %659 }
 0x12a   :  { %v187_v49 = vmul.f32 %v660_v48, %v185_v47  ;;  %vm193_vm3 = vweird.f32 %v660_v48 }
 0x12b   :  { %vm194_vm5 = vmor %vm192_vm4, %vm193_vm3 }
 0x12c   :  { %v188_v50 = vmul.f32 %v660_v48, %v187_v49 }
 0x12e   :  { %v189_v51 = vmul.f32 0.5, %v188_v50  ;;  %v367_v50 = vld [vmem:[#allocation8] sm:$0xff] }
 0x12f   :  { %414 = vmatpush.msra.mxu3 %v367_v50 }
 0x130   :  { %v190_v52 = vsub.f32 1.5, %v189_v51  ;;  %v386_v51 = vld [vmem:[#allocation8 + $0x98] sm:$0xff] }
 0x131   :  { %431 = vmatpush.msrb.mxu0 %v386_v51 }
 0x132   :  { %v191_v53 = vmul.f32 %v660_v48, %v190_v52 }
 0x134   :  { %v195_v56 = vsel %vm194_vm5, %v660_v48, %v191_v53 }
 0x135   :  { %v196_v57 = vmul.f32 %v195_v56, %v184_v54  ;;  %v385_v54 = vld [vmem:[#allocation8 + $0x90] sm:$0xff] }
 0x136   :  { %432 = vmatpush.msrb.mxu0 %v385_v54 }
 0x137   :  { %v200_v59 = vmul.f32 %v651_v55, %v196_v57 }
 0x139   :  { %v204_v60 = vadd.f32 %v652_v58, %v200_v59  ;;  %v384_v59 = vld [vmem:[#allocation8 + $0x88] sm:$0xff] }
 0x13a   :  { %433 = vmatpush.msrb.mxu0 %v384_v59  ;;  %v481_v59 = vld [vmem:[#allocation10 + $0x38] sm:$0xff] }
 0x13b   :  { %661 = vtanh.f32 %v204_v60 }
 0x13c   :  { %434 = vmatpush.msrb.mxu0 %v383_v62  ;;  %v478_v62 = vld [vmem:[#allocation10 + $0x20] sm:$0xff] }
 0x141   :  { %v955_v61 = vpop.eup %661 }
 0x142   :  { %630 = vmatmul.msk.f32.vlgmr.msra.gmra.mxu1 %vm165_vm1, %v955_v61  ;;  %631 = vmatmul.msk.f32.vlgmr.msra.gmra.mxu2 %vm165_vm1, %v955_v61 }
 0x1bf   :  { %v256_v5 = vpop.f32.mrf.mxu1 }
 0x1c0   :  { %v964_v6 = vadd.f32 %v256_v5, %v232_v2 }
 0x1c2   :  { %v967_v8 = vmul.f32 0.70710677, %v964_v6  ;;  %v279_v40 = vmul.f32 0.5, %v964_v6 }
 0x1c4   :  { %v283_v11 = vmul.f32 %v967_v8, %v967_v8 }
 0x1c5   :  { %v276_v13 = vpop.f32.mrf.mxu2 }
 0x1c6   :  { %v971_v14 = vmin.f32 %v283_v11, 16.0  ;;  %v973_v15 = vadd.f32 %v276_v13, %v233_v9 }
 0x1c8   :  { %v285_v17 = vmul.f32 2.1237322e-06, %v971_v14  ;;  %v977_v18 = vmul.f32 0.70710677, %v973_v15  ;;  %v296_v20 = vmul.f32 3.8918573e-05, %v971_v14 }
 0x1ca   :  { %v286_v21 = vadd.f32 0.00028619796, %v285_v17  ;;  %v323_v22 = vmul.f32 %v977_v18, %v977_v18  ;;  %v297_v24 = vadd.f32 0.001143296, %v296_v20 }
 0x1cc   :  { %v287_v25 = vmul.f32 %v286_v21, %v971_v14  ;;  %v983_v26 = vmin.f32 %v323_v22, 16.0  ;;  %v298_v30 = vmul.f32 %v297_v24, %v971_v14 }
 0x1ce   :  { %v325_v31 = vmul.f32 2.1237322e-06, %v983_v26  ;;  %v336_v32 = vmul.f32 3.8918573e-05, %v983_v26  ;;  %v288_v33 = vadd.f32 0.0036580483, %v287_v25 }
 0x1cf   :  { %v299_v36 = vadd.f32 0.014752088, %v298_v30 }
 0x1d0   :  { %v326_v37 = vadd.f32 0.00028619796, %v325_v31  ;;  %v337_v38 = vadd.f32 0.001143296, %v336_v32  ;;  %v289_v46 = vmul.f32 %v288_v33, %v971_v14 }
 0x1d1   :  { %v300_v41 = vmul.f32 %v299_v36, %v971_v14 }
 0x1d2   :  { %v327_v42 = vmul.f32 %v326_v37, %v983_v26  ;;  %v338_v43 = vmul.f32 %v337_v38, %v983_v26  ;;  %v290_v55 = vadd.f32 0.05243302, %v289_v46  ;;  %v280_v46 = vmul.f32 0.5, %v973_v15 }
 0x1d3   :  { %v301_v47 = vadd.f32 0.112945676, %v300_v41 }
 0x1d4   :  { %v328_v48 = vadd.f32 0.0036580483, %v327_v42  ;;  %v339_v49 = vadd.f32 0.014752088, %v338_v43  ;;  %v291_v0 = vmul.f32 %v290_v55, %v971_v14  ;;  %v485_v55 = vld [vmem:[#allocation10 + $0x58] sm:$0xff] }
 0x1d5   :  { %v302_v52 = vmul.f32 %v301_v47, %v971_v14  ;;  %522 = vmatpush.msrb.mxu1 %v485_v55 }
 0x1d6   :  { %v340_v53 = vmul.f32 %v339_v49, %v983_v26  ;;  %v329_v57 = vmul.f32 %v328_v48, %v983_v26  ;;  %v292_v5 = vadd.f32 0.18741608, %v291_v0 }
 0x1d7   :  { %v303_v56 = vadd.f32 0.4994258, %v302_v52 }
 0x1d8   :  { %v341_v58 = vadd.f32 0.112945676, %v340_v53  ;;  %v330_v2 = vadd.f32 0.05243302, %v329_v57  ;;  %v293_v11 = vmul.f32 %v292_v5, %v971_v14  ;;  %v483_v57 = vld [vmem:[#allocation10 + $0x48] sm:$0xff]  ;;  %v474_v5 = vld [vmem:[#allocation10] sm:$0xff] }
 0x1d9   :  { %v304_v60 = vmul.f32 %v303_v56, %v971_v14  ;;  %v484_v56 = vld [vmem:[#allocation10 + $0x50] sm:$0xff] }
 0x1da   :  { %v342_v63 = vmul.f32 %v341_v58, %v983_v26  ;;  %v331_v7 = vmul.f32 %v330_v2, %v983_v26  ;;  %v294_v17 = vadd.f32 1.1283791, %v293_v11  ;;  %523 = vmatpush.msrb.mxu1 %v484_v56  ;;  %v482_v58 = vld [vmem:[#allocation10 + $0x40] sm:$0xff] }
 0x1db   :  { %v305_v1 = vadd.f32 1.0, %v304_v60  ;;  %v480_v60 = vld [vmem:[#allocation10 + $0x30] sm:$0xff]  ;;  %v486_v2 = vld [vmem:[%s1049_s13] sm:$0xf] }
 0x1dc   :  { %v343_v3 = vadd.f32 0.4994258, %v342_v63  ;;  %v332_v12 = vadd.f32 0.18741608, %v331_v7  ;;  %v295_v27 = vmul.f32 %v294_v17, %v967_v8  ;;  %524 = vmatpush.msrb.mxu1 %v483_v57  ;;  %v477_v63 = vld [vmem:[#allocation10 + $0x18] sm:$0xff]  ;;  %635 = vmatpush.msk.msra.mxu0 %vm491_vm15, %v486_v2 }
 0x1dd   :  { %663 = vrcp.f32 %v305_v1  ;;  %v317_v19 = vand.u32 2147483648, %v305_v1  ;;  %v315_v23 = vand.u32 2147483647, %v305_v1  ;;  %vm311_vm7 = vweird.f32 %v305_v1 }
 0x1de   :  { %v344_v4 = vmul.f32 %v343_v3, %v983_v26  ;;  %v333_v21 = vmul.f32 %v332_v12, %v983_v26  ;;  %525 = vmatpush.msrb.mxu1 %v482_v58  ;;  %v475_v3 = vld [vmem:[#allocation10 + $0x8] sm:$0xff] }
 0x1df   :  { %v318_v30 = vor.u32 1.1754944e-38, %v317_v19  ;;  %vm316_vm9 = vcmp.eq.f32.partialorder %v315_v23, 8.507059e+37 }
 0x1e0   :  { %v345_v9 = vadd.f32 1.0, %v344_v4  ;;  %v334_v14 = vadd.f32 1.1283791, %v333_v21  ;;  %526 = vmatpush.msrb.mxu1 %v481_v59  ;;  %v131_v4 = vld [vmem:[%s1037_s1] sm:$0xff] }
 0x1e2   :  { %665 = vrcp.f32 %v345_v9  ;;  %v357_v31 = vand.u32 2147483648, %v345_v9  ;;  %v355_v34 = vand.u32 2147483647, %v345_v9  ;;  %vm351_vm11 = vweird.f32 %v345_v9  ;;  %527 = vmatpush.msrb.mxu1 %v480_v60 }
 0x1e3   :  { %v664_v10 = vpop.eup %663  ;;  %v335_v39 = vmul.f32 %v334_v14, %v977_v18  ;;  %v653_v18 = vld [vmem:[%s1045_s9] ss:$0 sm:$0xff] }
 0x1e4   :  { %v307_v13 = vmul.f32 %v664_v10, %v305_v1  ;;  %vm312_vm6 = vweird.f32 %v664_v10  ;;  %v358_v37 = vor.u32 1.1754944e-38, %v357_v31  ;;  %vm356_vm13 = vcmp.eq.f32.partialorder %v355_v34, 8.507059e+37  ;;  %v476_v1 = vld [vmem:[#allocation10 + $0x10] sm:$0xff]  ;;  %v656_v31 = vld [vmem:[%s1050_s14] ss:$0 sm:$0xff]  ;;  %s833_s14 = smov [#allocation11]  }
 0x1e5   :  { %vm313_vm8 = vmor %vm311_vm7, %vm312_vm6  ;;  %s615_s2 = sshll.u32 %s833_s14, 4  ;;  %s616_s2 = int_to_ptr.vmem [resolvable:$true] %s615_s2 }
 0x1e6   :  { %v308_v16 = vsub.f32 1.0, %v307_v13 }
 0x1e8   :  { %v666_v20 = vpop.eup %665  ;;  %v309_v22 = vmul.f32 %v664_v10, %v308_v16 }
 0x1e9   :  { %v347_v24 = vmul.f32 %v666_v20, %v345_v9  ;;  %vm352_vm10 = vweird.f32 %v666_v20 }
 0x1ea   :  { %v310_v25 = vadd.f32 %v664_v10, %v309_v22  ;;  %vm353_vm12 = vmor %vm351_vm11, %vm352_vm10 }
 0x1eb   :  { %v348_v28 = vsub.f32 1.0, %v347_v24  ;;  %v654_v24 = vld [vmem:[%s1046_s10] ss:$0 sm:$0xff] }
 0x1ec   :  { %v314_v32 = vsel %vm313_vm8, %v664_v10, %v310_v25  ;;  %vm608_vm8 = vcmask 57344  }
 0x1ed   :  { %v349_v33 = vmul.f32 %v666_v20, %v348_v28  ;;  %v319_v35 = vsel %vm316_vm9, %v318_v30, %v314_v32 }
 0x1ee   :  { %v320_v26 = vmul.f32 %v319_v35, %v295_v27 }
 0x1ef   :  { %v350_v36 = vadd.f32 %v666_v20, %v349_v33 }
 0x1f0   :  { %v632_v38 = vclamps-f32 %v320_v26, 1.0 }
 0x1f1   :  { %v354_v8 = vsel %vm353_vm12, %v666_v20, %v350_v36 }
 0x1f2   :  { %v359_v41 = vsel %vm356_vm13, %v358_v37, %v354_v8  ;;  %v363_v42 = vadd.f32 1.0, %v632_v38 }
 0x1f3   :  { %v360_v43 = vmul.f32 %v359_v41, %v335_v39 }
 0x1f4   :  { %v365_v44 = vmul.f32 %v363_v42, %v279_v40 }
 0x1f5   :  { %v633_v45 = vclamps-f32 %v360_v43, 1.0 }
 0x1f6   :  { %415 = vmatmul.f32.vlgmr.msra.gmra.mxu3 %v365_v44 }
 0x1f7   :  { %v364_v47 = vadd.f32 1.0, %v633_v45 }
 0x1f9   :  { %v366_v48 = vmul.f32 %v364_v47, %v280_v46 }
 0x1fb   :  { %634 = vmatmul.msk.f32.vlgmr.msrb.gmra.mxu0 %vm395_vm14, %v366_v48 }
 0x203   :  { %636 = vmatmul.msk.f32.vlgmr.msra.gmra.mxu0 %vm487_vm0, %v131_v4 }
 0x278   :  { %v436_v51 = vpop.f32.mrf.mxu0 }
 0x279   :  { %v416_v49 = vpop.f32.mrf.mxu3 }
 0x27a   :  { %v417_v50 = vadd.f32 %v653_v18, %v416_v49 }
 0x27c   :  { %v437_v6 = vadd.f32 %v436_v51, %v417_v50 }
 0x27e   :  { %v439_v52 = vadd.f32 %v955_v61, %v437_v6  ;;  %v479_v61 = vld [vmem:[#allocation10 + $0x28] sm:$0xff] }
 0x27f   :  { %528 = vmatpush.msrb.mxu1 %v479_v61 }
 0x280   :  { %v442_v53 = vsel %vm165_vm1, %v439_v52, 0.0  ;;  %v446_v54 = vmul.f32 %v439_v52, %v439_v52  ;;  %v512_v14 = vpop.f32.mrf.mxu0 }
 0x281   :  { %443 = vadd.xlane.f32.xlu1 %v442_v53  ;;  %529 = vmatpush.msrb.mxu1 %v478_v62 }
 0x282   :  { %v447_v15 = vsel %vm165_vm1, %v446_v54, 0.0 }
 0x283   :  { %530 = vmatpush.msrb.mxu1 %v477_v63 }
 0x285   :  { %531 = vmatpush.msrb.mxu1 %v476_v1 }
 0x287   :  { %532 = vmatpush.msrb.mxu1 %v475_v3 }
 0x289   :  { %448 = vadd.xlane.f32.xlu1 %v447_v15  ;;  %533 = vmatpush.msrb.mxu1 %v474_v5  ;;  %v587_v5 = vld [vmem:[%s1051_s15] sm:$0x1] }
 0x2f4   :  { %v444_v0 = vpop.xlane.xlu1 %443 }
 0x2f5   :  { %v445_v7 = vmul.f32 %v444_v0, %v944_v29 }
 0x2f7   :  { %v451_v10 = vmul.f32 %v445_v7, %v445_v7  ;;  %v453_v23 = vsub.f32 %v439_v52, %v445_v7 }
 0x2fc   :  { %v449_v9 = vpop.xlane.xlu1 %448 }
 0x2fd   :  { %v450_v11 = vmul.f32 %v449_v9, %v944_v29  ;;  %v655_v29 = vld [vmem:[%s1047_s11] ss:$0 sm:$0xff] }
 0x2ff   :  { %v452_v12 = vsub.f32 %v450_v11, %v451_v10 }
 0x301   :  { %v454_v13 = vadd.f32 1e-05, %v452_v12 }
 0x303   :  { %667 = vrsqrt.f32 %v454_v13  ;;  %vm461_vm3 = vweird.f32 %v454_v13 }
 0x309   :  { %v668_v16 = vpop.eup %667 }
 0x30a   :  { %v456_v17 = vmul.f32 %v668_v16, %v454_v13  ;;  %vm462_vm2 = vweird.f32 %v668_v16 }
 0x30b   :  { %vm463_vm4 = vmor %vm461_vm3, %vm462_vm2 }
 0x30c   :  { %v457_v19 = vmul.f32 %v668_v16, %v456_v17 }
 0x30e   :  { %v458_v20 = vmul.f32 0.5, %v457_v19 }
 0x310   :  { %v459_v21 = vsub.f32 1.5, %v458_v20 }
 0x312   :  { %v460_v22 = vmul.f32 %v668_v16, %v459_v21 }
 0x314   :  { %v464_v25 = vsel %vm463_vm4, %v668_v16, %v460_v22 }
 0x315   :  { %v465_v27 = vmul.f32 %v464_v25, %v453_v23 }
 0x317   :  { %v469_v28 = vmul.f32 %v654_v24, %v465_v27 }
 0x319   :  { %v473_v30 = vadd.f32 %v655_v29, %v469_v28 }
 0x31b   :  { %637 = vmatmul.msk.f32.vlgmr.msrb.gmra.mxu1 %vm165_vm1, %v473_v30 }
 0x398   :  { %v535_v32 = vpop.f32.mrf.mxu1 }
 0x399   :  { %v536_v33 = vadd.f32 %v535_v32, %v512_v14 }
 0x39b   :  { %v542_v34 = vadd.f32 %v656_v31, %v536_v33 }
 0x39d   :  { %v544_v35 = vmul.f32 0.70710677, %v542_v34  ;;  %v543_v2 = vmul.f32 0.5, %v542_v34 }
 0x39f   :  { %v545_v26 = vmul.f32 %v544_v35, %v544_v35 }
 0x3a1   :  { %v546_v36 = vmin.f32 %v545_v26, 16.0 }
 0x3a3   :  { %v547_v37 = vmul.f32 2.1237322e-06, %v546_v36  ;;  %v558_v38 = vmul.f32 3.8918573e-05, %v546_v36 }
 0x3a5   :  { %v548_v39 = vadd.f32 0.00028619796, %v547_v37  ;;  %v559_v8 = vadd.f32 0.001143296, %v558_v38 }
 0x3a7   :  { %v549_v40 = vmul.f32 %v548_v39, %v546_v36  ;;  %v560_v41 = vmul.f32 %v559_v8, %v546_v36 }
 0x3a9   :  { %v561_v42 = vadd.f32 0.014752088, %v560_v41  ;;  %v550_v43 = vadd.f32 0.0036580483, %v549_v40 }
 0x3ab   :  { %v562_v44 = vmul.f32 %v561_v42, %v546_v36  ;;  %v551_v46 = vmul.f32 %v550_v43, %v546_v36 }
 0x3ad   :  { %v563_v45 = vadd.f32 0.112945676, %v562_v44  ;;  %v552_v18 = vadd.f32 0.05243302, %v551_v46 }
 0x3af   :  { %v564_v47 = vmul.f32 %v563_v45, %v546_v36  ;;  %v553_v51 = vmul.f32 %v552_v18, %v546_v36 }
 0x3b1   :  { %v565_v48 = vadd.f32 0.4994258, %v564_v47  ;;  %v554_v6 = vadd.f32 0.18741608, %v553_v51 }
 0x3b3   :  { %v566_v49 = vmul.f32 %v565_v48, %v546_v36  ;;  %v555_v53 = vmul.f32 %v554_v6, %v546_v36 }
 0x3b5   :  { %v567_v50 = vadd.f32 1.0, %v566_v49  ;;  %v556_v56 = vadd.f32 1.1283791, %v555_v53 }
 0x3b7   :  { %669 = vrcp.f32 %v567_v50  ;;  %v579_v55 = vand.u32 2147483648, %v567_v50  ;;  %v577_v58 = vand.u32 2147483647, %v567_v50  ;;  %vm573_vm5 = vweird.f32 %v567_v50 }
 0x3b8   :  { %v557_v61 = vmul.f32 %v556_v56, %v544_v35 }
 0x3b9   :  { %v580_v60 = vor.u32 1.1754944e-38, %v579_v55  ;;  %vm578_vm7 = vcmp.eq.f32.partialorder %v577_v58, 8.507059e+37 }
 0x3bd   :  { %v670_v52 = vpop.eup %669 }
 0x3be   :  { %v569_v54 = vmul.f32 %v670_v52, %v567_v50  ;;  %vm574_vm1 = vweird.f32 %v670_v52 }
 0x3bf   :  { %vm575_vm6 = vmor %vm573_vm5, %vm574_vm1 }
 0x3c0   :  { %v570_v15 = vsub.f32 1.0, %v569_v54 }
 0x3c2   :  { %v571_v57 = vmul.f32 %v670_v52, %v570_v15 }
 0x3c4   :  { %v572_v59 = vadd.f32 %v670_v52, %v571_v57 }
 0x3c6   :  { %v576_v62 = vsel %vm575_vm6, %v670_v52, %v572_v59 }
 0x3c7   :  { %v581_v63 = vsel %vm578_vm7, %v580_v60, %v576_v62 }
 0x3c8   :  { %v582_v0 = vmul.f32 %v581_v63, %v557_v61 }
 0x3ca   :  { %v638_v1 = vclamps-f32 %v582_v0, 1.0 }
 0x3cc   :  { %v585_v3 = vadd.f32 1.0, %v638_v1 }
 0x3ce   :  { %v586_v4 = vmul.f32 %v585_v3, %v543_v2 }
 0x3d0   :  { %603 = vmatpush.xpose.msrb.mxu2 %v586_v4 }
 0x3d3   :  { %604 = vmatmul.f32.vlgmr.msrb.gmra.mxu2 %v587_v5 }
 0x456   :  { %v605_v7 = vpop.f32.mrf.mxu2 }
 0x457   :  { %609 = vst.msk [vmem:[#allocation11] sm:$0x1] %vm608_vm8, %v605_v7 }
 0x458   :  { %620 = dma.vmem_to_hbm [thread:$0]  %s616_s2, 16, %s618_s28, [#allocation4]  }
 0x459   :  { %821 = dma.done.wait [#allocation4], 16  }
 0x45a   :  { %822 = vsyncadd [#allocation4], 4294967280 }
 0x45b   :  { %625 = vsyncpa [#allocation3], 1 }
 0x45c   :  { %626 = vsyncpa [#allocation6], 1 }
 0x45d   :  { %627 = vsyncpa [#allocation9], 1 }
 0x45e   :  { %628 = vsyncpa [#allocation4], 1 }

</bundles_post_ra>
